<compile_context>
chip_gen: v6e
topology: v6e:2x2x1
jax: 0.10.0
libtpu: 0.0.40
codegen_flags: <defaults>
</compile_context>

<pallas_src>
import jax
import jax.numpy as jnp
from jax import lax
from jax.experimental import pallas as pl
from jax.experimental.pallas import tpu as pltpu


# ---------------------------------------------------------------------------
# Kernel
# ---------------------------------------------------------------------------
def _make_kernel(bt, tq, d, return_y):
    def kernel(p1_ref, p2_ref, m_ref, u_ref, v_ref, c_ref, *refs):
        if return_y:
            x_ref, y_ref = refs[0], refs[1]
            acc_ref, qproj_ref, rowb_ref = refs[2], refs[3], refs[4]
        else:
            x_ref, y_ref = refs[0], None
            acc_ref, qproj_ref, rowb_ref = refs[1], refs[2], refs[3]

        k = pl.program_id(2)
        p2b = p2_ref[...].astype(jnp.bfloat16)           # (bt, tk, d) MXU operand

        # Per-(batch, query)-block setup, cached across the key sweep:
        #   q_proj = P1 @ M + v  (bf16),   row_bias = P1 @ u + c  (f32)
        @pl.when(k == 0)
        def _():
            p1 = p1_ref[...]                             # (bt, tq, d) f32
            qp = jnp.dot(p1.reshape(bt * tq, d).astype(jnp.bfloat16), m_ref[...],
                         preferred_element_type=jnp.float32)
            qp = qp + v_ref[...]                         # fold column bias (W2^T b1)
            qproj_ref[...] = qp.reshape(bt, tq, d).astype(jnp.bfloat16)
            rowb_ref[...] = (jnp.sum(p1 * u_ref[...], axis=-1, keepdims=True)
                             + c_ref[...])
            acc_ref[...] = jnp.zeros_like(acc_ref)

        # E tile = sigmoid(q_proj @ P2_tile^T + row_bias); the transpose is
        # folded into the contraction dims, sigmoid uses EUP exp + approx
        # reciprocal and feeds the MXU directly in bf16.
        logits = lax.dot_general(qproj_ref[...], p2b,
                                 (((2,), (2,)), ((0,), (0,))),
                                 preferred_element_type=jnp.float32)  # (bt,tq,tk)
        logits = logits + rowb_ref[...]
        e = pl.reciprocal(1.0 + jnp.exp(-logits), approx=True).astype(jnp.bfloat16)

        # Y partial sum for this key tile (exact: sigmoid is elementwise).
        acc_ref[...] += lax.dot_general(e, p2b, (((2,), (1,)), ((0,), (0,))),
                                        preferred_element_type=jnp.float32)

        # Epilogue on the last key tile: X = (plan1*Y + Y - plan1)/2.
        @pl.when(k == pl.num_programs(2) - 1)
        def _():
            p1 = p1_ref[...]
            y = acc_ref[...]
            x = ((p1 + 1.0) * y - p1) * 0.5
            x_ref[...] = x.astype(x_ref.dtype)
            if y_ref is not None:
                y_ref[...] = y.astype(y_ref.dtype)

    return kernel


# ---------------------------------------------------------------------------
# VMEM-aware tile selection
# ---------------------------------------------------------------------------
def _vmem_capacity_bytes():
    try:
        cap = getattr(pltpu.get_tpu_info(), "vmem_capacity_bytes", None)
        if cap:
            return int(cap)
    except Exception:
        pass
    return 64 << 20          # conservative default (v7x-class)


def _tile_bytes(rows, cols, itemsize):
    """(8,128)-padded VMEM footprint of one 2-D tile."""
    sub = {4: 8, 2: 16, 1: 32}[itemsize]
    rows_p = -(-rows // sub) * sub
    cols_p = -(-cols // 128) * 128
    return rows_p * cols_p * itemsize


def _vmem_estimate(bt, tq, tk, d, n_out):
    f32, bf16 = 4, 2
    tot = 2 * bt * _tile_bytes(tq, d, f32)                 # plan1 block (x2 buffers)
    tot += 2 * bt * _tile_bytes(tk, d, f32)                # plan2 block (x2 buffers)
    tot += _tile_bytes(d, d, bf16)                         # M (single buffered)
    tot += 2 * _tile_bytes(1, d, f32) + _tile_bytes(1, 1, f32)   # u, v, c
    tot += n_out * 2 * bt * _tile_bytes(tq, d, f32)        # X (+Y) blocks
    tot += bt * _tile_bytes(tq, d, f32)                    # Y accumulator scratch
    tot += bt * _tile_bytes(tq, d, bf16)                   # cached q-projection
    tot += bt * _tile_bytes(tq, 1, f32)                    # cached row bias
    tot += bt * (_tile_bytes(tq, tk, f32) + _tile_bytes(tq, tk, bf16))  # logits / E
    tot += bt * _tile_bytes(tk, d, bf16)                   # plan2 bf16 copy
    tot += bt * _tile_bytes(tq, d, bf16)                   # plan1/q_proj bf16 temp
    tot += bt * _tile_bytes(tq, d, f32)                    # Y partial / epilogue temp
    return tot


def _seq_tile_candidates(s):
    cands = {s}
    for t in range(8, s, 8):
        if s % t == 0:
            cands.add(t)
    return sorted(cands)


def _select_tiles(b, s, d, n_out, budget):
    """Pick (Bt, Tq, Tk) so the (8,128)-padded working set fits `budget`."""
    cands = _seq_tile_candidates(s)

    # Query/key tiles: maximise min(Tq, Tk) (square-ish, MXU-friendly E tiles),
    # tie-break on the larger Tq. Shrinking Tk (not a resident key block) is
    # what lets long-S cases fit v7x's 64 MiB.
    best = None
    for tq in cands:
        for tk in cands:
            if _vmem_estimate(1, tq, tk, d, n_out) > budget:
                continue
            score = (min(tq, tk), tq)
            if best is None or score > best[0]:
                best = (score, tq, tk)
    if best is None:
        # TODO(synk): for very large D even the smallest sequence tiles exceed
        # the budget; a D-axis split of the Y accumulation would be needed.
        tq = tk = cands[0]
    else:
        tq, tk = best[1], best[2]

    # Batch tile: only in the small-S (full sequence per step) regime, to
    # amortise the ~0.35us per-grid-step overhead; keep >= 2 parallel grid
    # points whenever possible so a v7x megacore still has work to split.
    bt = 1
    if tq == s and tk == s and s % 8 == 0:
        for cand in range(2, min(b, 16) + 1):
            if b % cand:
                continue
            if (b // cand) * (s // tq) < 2 <= b * (s // tq):
                continue
            if _vmem_estimate(cand, tq, tk, d, n_out) <= budget:
                bt = cand
    return bt, tq, tk


# ---------------------------------------------------------------------------
# Wrapper
# ---------------------------------------------------------------------------
def attention_plus(plan1, plan2, w1, b1, w2, b2, *, return_y=True,
                   batch_tile=None, tile_q=None, tile_k=None):
    """plan1, plan2: (B, S, D) f32.  w*: (k_dim, D), b*: (k_dim,) nn.Linear params."""
    B, S, D = plan1.shape
    f32, bf16 = jnp.float32, jnp.bfloat16

    w1f, w2f = jnp.asarray(w1, f32), jnp.asarray(w2, f32)
    b1f, b2f = jnp.asarray(b1, f32), jnp.asarray(b2, f32)

    # Fold the two Linear layers algebraically (exact in f32):
    #   logits = P1 M P2^T + (P1 u) 1^T + 1 (P2 v)^T + c
    # TODO(synk): for embed_dim >> round_up(k_dim, 128) an unfolded two-Linear
    # kernel does less MXU work; the folded path is exact and optimal for the
    # K <= D regime this module targets.
    m_bf = (w1f.T @ w2f).astype(bf16)                    # (D, D)
    u = (w1f.T @ b2f).reshape(1, D).astype(f32)          # row-bias vector
    v = (w2f.T @ b1f).reshape(1, D).astype(f32)          # folded into q_proj rows
    c = (b1f @ b2f).reshape(1, 1).astype(f32)

    # Generation-aware VMEM budgets.
    cap = _vmem_capacity_bytes()
    if cap <= (96 << 20):          # v7x-class: 64 MiB physical per TensorCore
        budget, vmem_limit = 26 << 20, 48 << 20
    else:                          # v5e / v6e: 128 MiB physical
        budget, vmem_limit = 56 << 20, 100 << 20

    n_out = 2 if return_y else 1
    Bt, Tq, Tk = _select_tiles(B, S, D, n_out, budget)
    if batch_tile is not None:
        Bt = batch_tile
    if tile_q is not None:
        Tq = tile_q
    if tile_k is not None:
        Tk = tile_k
    assert B % Bt == 0 and S % Tq == 0 and S % Tk == 0
    nq, nk = S // Tq, S // Tk
    grid = (B // Bt, nq, nk)

    per_q3 = lambda b, q, k: (b, q, 0)       # plan1 / X / Y query tile
    per_k3 = lambda b, q, k: (b, k, 0)       # plan2 key tile
    whole2 = lambda b, q, k: (0, 0)          # grid-invariant folded parameters

    # plan2's block index changes only with the slow batch axis when nk == 1:
    # single-buffer it there (halves its VMEM); otherwise it changes every
    # innermost step and needs double buffering.
    p2_kwargs = {"pipeline_mode": pl.Buffered(1)} if (nk == 1 and nq > 1) else {}

    in_specs = [
        pl.BlockSpec((Bt, Tq, D), per_q3),                                  # plan1
        pl.BlockSpec((Bt, Tk, D), per_k3, **p2_kwargs),                     # plan2
        pl.BlockSpec((D, D), whole2, pipeline_mode=pl.Buffered(1)),         # M
        pl.BlockSpec((1, D), whole2, pipeline_mode=pl.Buffered(1)),         # u
        pl.BlockSpec((1, D), whole2, pipeline_mode=pl.Buffered(1)),         # v
        pl.BlockSpec((1, 1), whole2, pipeline_mode=pl.Buffered(1)),         # c
    ]

    one_out_shape = jax.ShapeDtypeStruct((B, S, D), plan1.dtype)
    one_out_spec = pl.BlockSpec((Bt, Tq, D), per_q3)
    out_shape = (one_out_shape,) * n_out
    out_specs = (one_out_spec,) * n_out

    kernel = _make_kernel(Bt, Tq, D, return_y)

    outs = pl.pallas_call(
        kernel,
        out_shape=out_shape,
        grid_spec=pltpu.PrefetchScalarGridSpec(
            num_scalar_prefetch=0,
            grid=grid,
            in_specs=in_specs,
            out_specs=out_specs,
            scratch_shapes=[
                pltpu.VMEM((Bt, Tq, D), jnp.float32),    # Y accumulator
                pltpu.VMEM((Bt, Tq, D), jnp.bfloat16),   # cached q-projection
                pltpu.VMEM((Bt, Tq, 1), jnp.float32),    # cached row bias
            ]),
        compiler_params=pltpu.CompilerParams(
            dimension_semantics=("parallel", "parallel", "arbitrary"),
            vmem_limit_bytes=vmem_limit),
    )(plan1, plan2, m_bf, u, v, c)

    if return_y:
        return outs[0], outs[1]
    return outs[0]


# ---------------------------------------------------------------------------
# References
# ---------------------------------------------------------------------------
def attention_plus_ref(plan1, plan2, w1, b1, w2, b2):
    """Pure-f32 module semantics."""
    ws1 = plan1 @ w1.T + b1
    ws2 = plan2 @ w2.T + b2
    e = jax.nn.sigmoid(jnp.einsum('bik,bjk->bij', ws1, ws2))
    y = jnp.einsum('bij,bjd->bid', e, plan2)
    x = (plan1 * y + y - plan1) / 2.0
    return x, y


def attention_plus_ref_bf16(plan1, plan2, w1, b1, w2, b2):
    """Mirrors the kernel's folded-linear bf16-operand / f32-accumulate math."""
    bf, f32 = jnp.bfloat16, jnp.float32
    m_bf = (w1.T @ w2).astype(bf)
    u = w1.T @ b2
    v = w2.T @ b1
    c = b1 @ b2
    qp = (jnp.einsum('bsd,de->bse', plan1.astype(bf), m_bf,
                     preferred_element_type=f32) + v).astype(bf)
    rowb = jnp.einsum('bsd,d->bs', plan1, u)[..., None] + c
    logits = jnp.einsum('bqd,bkd->bqk', qp, plan2.astype(bf),
                        preferred_element_type=f32) + rowb
    e = jax.nn.sigmoid(logits)
    y = jnp.einsum('bqk,bkd->bqd', e.astype(bf), plan2.astype(bf),
                   preferred_element_type=f32)
    x = ((plan1 + 1.0) * y - plan1) * 0.5
    return x, y


# ---------------------------------------------------------------------------
# Test harness
# ---------------------------------------------------------------------------
if __name__ == "__main__":
    def rel_err(a, b):
        a = a.astype(jnp.float32)
        b = b.astype(jnp.float32)
        return float(jnp.linalg.norm(a - b) / (jnp.linalg.norm(b) + 1e-30))

    def make_inputs(key, B, S, D, K):
        ks = jax.random.split(key, 6)
        plan1 = jax.random.normal(ks[0], (B, S, D), jnp.float32)
        plan2 = jax.random.normal(ks[1], (B, S, D), jnp.float32)
        bound = 1.0 / (D ** 0.5)
        w1 = jax.random.uniform(ks[2], (K, D), jnp.float32, -bound, bound)
        b1 = jax.random.uniform(ks[3], (K,), jnp.float32, -bound, bound)
        w2 = jax.random.uniform(ks[4], (K, D), jnp.float32, -bound, bound)
        b2 = jax.random.uniform(ks[5], (K,), jnp.float32, -bound, bound)
        return plan1, plan2, w1, b1, w2, b2

    def check(args, **kw):
        plan1, plan2, w1, b1, w2, b2 = args
        x, y = attention_plus(plan1, plan2, w1, b1, w2, b2, **kw)
        jax.block_until_ready((x, y))
        # Tight check vs a reference feeding the same bf16-rounded operands.
        x_bf, y_bf = attention_plus_ref_bf16(plan1, plan2, w1, b1, w2, b2)
        assert rel_err(y, y_bf) < 0.02, "Y mismatch vs bf16-matched reference"
        assert rel_err(x, x_bf) < 0.02, "X mismatch vs bf16-matched reference"
        # Sanity check vs the exact-f32 module semantics.
        x_f, y_f = attention_plus_ref(plan1, plan2, w1, b1, w2, b2)
        assert rel_err(y, y_f) < 0.06, "Y too far from f32 reference"
        assert rel_err(x, x_f) < 0.06, "X too far from f32 reference"
        return x, y

    key = jax.random.PRNGKey(0)

    # 1) Module-sized case (B=2, S=8, embed_dim=32, k_dim=16), auto tile select.
    args1 = make_inputs(key, 2, 8, 32, 16)
    x1, _ = check(args1)
    # X-only path (halves HBM write traffic) must match bit-for-bit.
    x_only = attention_plus(*args1, return_y=False)
    jax.block_until_ready(x_only)
    assert rel_err(x_only, x1) < 1e-5

    # 2) Key-axis accumulation + per-(batch,query)-block caching + batch tile.
    args2 = make_inputs(jax.random.fold_in(key, 1), 2, 256, 32, 16)
    check(args2, batch_tile=2, tile_q=64, tile_k=64)

    # 3) Query tiling with a single key step (single-buffered plan2 path).
    args3 = make_inputs(jax.random.fold_in(key, 2), 2, 256, 32, 16)
    check(args3, tile_q=64, tile_k=256)

    print("KERNEL_OK")
</pallas_src>

<mosaic_0001>
module attributes {stable_mosaic.version = 11 : i64} {
  func.func @kernel(%arg0: i32, %arg1: i32, %arg2: i32, %arg3: memref<1x8x32xf32, #tpu.memory_space<vmem>>, %arg4: memref<1x8x32xf32, #tpu.memory_space<vmem>>, %arg5: memref<32x32xbf16, #tpu.memory_space<vmem>>, %arg6: memref<1x32xf32, #tpu.memory_space<vmem>>, %arg7: memref<1x32xf32, #tpu.memory_space<vmem>>, %arg8: memref<1x1xf32, #tpu.memory_space<vmem>>, %arg9: memref<1x8x32xf32, #tpu.memory_space<vmem>>, %arg10: memref<1x8x32xf32, #tpu.memory_space<vmem>>, %arg11: memref<1x8x32xf32, #tpu.memory_space<vmem>>, %arg12: memref<1x8x32xbf16, #tpu.memory_space<vmem>>, %arg13: memref<1x8x1xf32, #tpu.memory_space<vmem>>) attributes {dimension_semantics = [#tpu.dimension_semantics<parallel>, #tpu.dimension_semantics<parallel>, #tpu.dimension_semantics<arbitrary>], iteration_bounds = array<i64: 2, 1, 1>, scalar_prefetch = 0 : i64, scratch_operands = 3 : i64, tpu.core_type = #tpu.core_type<tc>, window_params = [{transform_indices = @transform_0, window_bounds = array<i64: 1, 8, 32>}, {transform_indices = @transform_1, window_bounds = array<i64: 1, 8, 32>}, {pipeline_mode = #tpu.pipeline_mode<synchronous>, transform_indices = @transform_2, window_bounds = array<i64: 32, 32>}, {pipeline_mode = #tpu.pipeline_mode<synchronous>, transform_indices = @transform_3, window_bounds = array<i64: 1, 32>}, {pipeline_mode = #tpu.pipeline_mode<synchronous>, transform_indices = @transform_4, window_bounds = array<i64: 1, 32>}, {pipeline_mode = #tpu.pipeline_mode<synchronous>, transform_indices = @transform_5, window_bounds = array<i64: 1, 1>}, {transform_indices = @transform_6, window_bounds = array<i64: 1, 8, 32>}, {transform_indices = @transform_7, window_bounds = array<i64: 1, 8, 32>}]} {
    %c0 = arith.constant 0 : index
    %c0_0 = arith.constant 0 : index
    %c0_1 = arith.constant 0 : index
    %0 = vector.load %arg4[%c0, %c0_0, %c0_1] : memref<1x8x32xf32, #tpu.memory_space<vmem>>, vector<1x8x32xf32>
    %1 = arith.truncf %0 : vector<1x8x32xf32> to vector<1x8x32xbf16>
    %c0_i32 = arith.constant 0 : i32
    %2 = arith.cmpi eq, %arg2, %c0_i32 : i32
    %3 = arith.extui %2 : i1 to i32
    %c0_i32_2 = arith.constant 0 : i32
    %4 = arith.cmpi ne, %3, %c0_i32_2 : i32
    scf.if %4 {
      %c0_20 = arith.constant 0 : index
      %c0_21 = arith.constant 0 : index
      %c0_22 = arith.constant 0 : index
      %24 = vector.load %arg3[%c0_20, %c0_21, %c0_22] : memref<1x8x32xf32, #tpu.memory_space<vmem>>, vector<1x8x32xf32>
      %25 = vector.shape_cast %24 : vector<1x8x32xf32> to vector<8x32xf32>
      %26 = arith.truncf %25 : vector<8x32xf32> to vector<8x32xbf16>
      %c0_23 = arith.constant 0 : index
      %c0_24 = arith.constant 0 : index
      %27 = vector.load %arg5[%c0_23, %c0_24] : memref<32x32xbf16, #tpu.memory_space<vmem>>, vector<32x32xbf16>
      %cst_25 = arith.constant dense<0.000000e+00> : vector<8x32xf32>
      %28 = tpu.matmul %26, %27, %cst_25 {dimension_numbers = #tpu.dot_dimension_numbers<[1], [0], [0], [1], [0, 0, 1, 1], [], []>} : vector<8x32xbf16>, vector<32x32xbf16>, vector<8x32xf32> -> vector<8x32xf32>
      %c0_26 = arith.constant 0 : index
      %c0_27 = arith.constant 0 : index
      %29 = vector.load %arg7[%c0_26, %c0_27] : memref<1x32xf32, #tpu.memory_space<vmem>>, vector<1x32xf32>
      %30 = vector.broadcast %29 : vector<1x32xf32> to vector<8x32xf32>
      %31 = arith.addf %28, %30 : vector<8x32xf32>
      %32 = vector.shape_cast %31 : vector<8x32xf32> to vector<1x8x32xf32>
      %33 = arith.truncf %32 : vector<1x8x32xf32> to vector<1x8x32xbf16>
      %c0_28 = arith.constant 0 : index
      %c0_29 = arith.constant 0 : index
      %c0_30 = arith.constant 0 : index
      %34 = vector.load %arg12[%c0_28, %c0_29, %c0_30] : memref<1x8x32xbf16, #tpu.memory_space<vmem>>, vector<1x8x32xbf16>
      tpu.vector_store %arg12[%c0_28, %c0_29, %c0_30], %33 {strides = array<i32>} : memref<1x8x32xbf16, #tpu.memory_space<vmem>>, vector<1x8x32xbf16>,
      %c0_31 = arith.constant 0 : index
      %c0_32 = arith.constant 0 : index
      %35 = vector.load %arg6[%c0_31, %c0_32] : memref<1x32xf32, #tpu.memory_space<vmem>>, vector<1x32xf32>
      %36 = vector.shape_cast %35 : vector<1x32xf32> to vector<1x1x32xf32>
      %37 = vector.broadcast %36 : vector<1x1x32xf32> to vector<1x8x32xf32>
      %38 = arith.mulf %24, %37 : vector<1x8x32xf32>
      %cst_33 = arith.constant dense<0.000000e+00> : vector<1x8xf32>
      %39 = vector.multi_reduction <add>, %38, %cst_33 [2] : vector<1x8x32xf32> to vector<1x8xf32>
      %40 = vector.shape_cast %39 : vector<1x8xf32> to vector<1x8x1xf32>
      %c0_34 = arith.constant 0 : index
      %c0_35 = arith.constant 0 : index
      %41 = vector.load %arg8[%c0_34, %c0_35] : memref<1x1xf32, #tpu.memory_space<vmem>>, vector<1x1xf32>
      %42 = vector.shape_cast %41 : vector<1x1xf32> to vector<1x1x1xf32>
      %43 = vector.broadcast %42 : vector<1x1x1xf32> to vector<1x8x1xf32>
      %44 = arith.addf %40, %43 : vector<1x8x1xf32>
      %c0_36 = arith.constant 0 : index
      %c0_37 = arith.constant 0 : index
      %c0_38 = arith.constant 0 : index
      %45 = vector.load %arg13[%c0_36, %c0_37, %c0_38] : memref<1x8x1xf32, #tpu.memory_space<vmem>>, vector<1x8x1xf32>
      tpu.vector_store %arg13[%c0_36, %c0_37, %c0_38], %44 {strides = array<i32>} : memref<1x8x1xf32, #tpu.memory_space<vmem>>, vector<1x8x1xf32>,
      %cst_39 = arith.constant 0.000000e+00 : f32
      %46 = vector.broadcast %cst_39 : f32 to vector<1x8x32xf32>
      %c0_40 = arith.constant 0 : index
      %c0_41 = arith.constant 0 : index
      %c0_42 = arith.constant 0 : index
      %47 = vector.load %arg11[%c0_40, %c0_41, %c0_42] : memref<1x8x32xf32, #tpu.memory_space<vmem>>, vector<1x8x32xf32>
      tpu.vector_store %arg11[%c0_40, %c0_41, %c0_42], %46 {strides = array<i32>} : memref<1x8x32xf32, #tpu.memory_space<vmem>>, vector<1x8x32xf32>,
    } else {
    }
    %c0_3 = arith.constant 0 : index
    %c0_4 = arith.constant 0 : index
    %c0_5 = arith.constant 0 : index
    %5 = vector.load %arg12[%c0_3, %c0_4, %c0_5] : memref<1x8x32xbf16, #tpu.memory_space<vmem>>, vector<1x8x32xbf16>
    %cst = arith.constant dense<0.000000e+00> : vector<1x8x8xf32>
    %6 = tpu.matmul %5, %1, %cst {dimension_numbers = #tpu.dot_dimension_numbers<[2], [2], [1], [1], [0, 0, 0, 1, 1, 1], [0], [0]>} : vector<1x8x32xbf16>, vector<1x8x32xbf16>, vector<1x8x8xf32> -> vector<1x8x8xf32>
    %c0_6 = arith.constant 0 : index
    %c0_7 = arith.constant 0 : index
    %c0_8 = arith.constant 0 : index
    %7 = vector.load %arg13[%c0_6, %c0_7, %c0_8] : memref<1x8x1xf32, #tpu.memory_space<vmem>>, vector<1x8x1xf32>
    %8 = vector.broadcast %7 : vector<1x8x1xf32> to vector<1x8x8xf32>
    %9 = arith.addf %6, %8 : vector<1x8x8xf32>
    %cst_9 = arith.constant 0.000000e+00 : f32
    %10 = vector.broadcast %cst_9 : f32 to vector<1x8x8xf32>
    %11 = arith.subf %10, %9 : vector<1x8x8xf32>
    %12 = math.exp %11 : vector<1x8x8xf32>
    %cst_10 = arith.constant 1.000000e+00 : f32
    %13 = vector.broadcast %cst_10 : f32 to vector<1x8x8xf32>
    %14 = arith.addf %13, %12 : vector<1x8x8xf32>
    %15 = tpu.reciprocal %14 {approx = true} : vector<1x8x8xf32> -> vector<1x8x8xf32>
    %16 = arith.truncf %15 : vector<1x8x8xf32> to vector<1x8x8xbf16>
    %c0_11 = arith.constant 0 : index
    %c0_12 = arith.constant 0 : index
    %c0_13 = arith.constant 0 : index
    %17 = vector.load %arg11[%c0_11, %c0_12, %c0_13] : memref<1x8x32xf32, #tpu.memory_space<vmem>>, vector<1x8x32xf32>
    %cst_14 = arith.constant dense<0.000000e+00> : vector<1x8x32xf32>
    %18 = tpu.matmul %16, %1, %cst_14 {dimension_numbers = #tpu.dot_dimension_numbers<[2], [1], [1], [2], [0, 0, 0, 1, 1, 2], [0], [0]>} : vector<1x8x8xbf16>, vector<1x8x32xbf16>, vector<1x8x32xf32> -> vector<1x8x32xf32>
    %19 = arith.addf %17, %18 : vector<1x8x32xf32>
    %c0_15 = arith.constant 0 : index
    %c0_16 = arith.constant 0 : index
    %c0_17 = arith.constant 0 : index
    %20 = vector.load %arg11[%c0_15, %c0_16, %c0_17] : memref<1x8x32xf32, #tpu.memory_space<vmem>>, vector<1x8x32xf32>
    tpu.vector_store %arg11[%c0_15, %c0_16, %c0_17], %19 {strides = array<i32>} : memref<1x8x32xf32, #tpu.memory_space<vmem>>, vector<1x8x32xf32>,
    %c0_i32_18 = arith.constant 0 : i32
    %21 = arith.cmpi eq, %arg2, %c0_i32_18 : i32
    %22 = arith.extui %21 : i1 to i32
    %c0_i32_19 = arith.constant 0 : i32
    %23 = arith.cmpi ne, %22, %c0_i32_19 : i32
    scf.if %23 {
      %c0_20 = arith.constant 0 : index
      %c0_21 = arith.constant 0 : index
      %c0_22 = arith.constant 0 : index
      %24 = vector.load %arg3[%c0_20, %c0_21, %c0_22] : memref<1x8x32xf32, #tpu.memory_space<vmem>>, vector<1x8x32xf32>
      %c0_23 = arith.constant 0 : index
      %c0_24 = arith.constant 0 : index
      %c0_25 = arith.constant 0 : index
      %25 = vector.load %arg11[%c0_23, %c0_24, %c0_25] : memref<1x8x32xf32, #tpu.memory_space<vmem>>, vector<1x8x32xf32>
      %cst_26 = arith.constant 1.000000e+00 : f32
      %26 = vector.broadcast %cst_26 : f32 to vector<1x8x32xf32>
      %27 = arith.addf %24, %26 : vector<1x8x32xf32>
      %28 = arith.mulf %27, %25 : vector<1x8x32xf32>
      %29 = arith.subf %28, %24 : vector<1x8x32xf32>
      %cst_27 = arith.constant 5.000000e-01 : f32
      %30 = vector.broadcast %cst_27 : f32 to vector<1x8x32xf32>
      %31 = arith.mulf %29, %30 : vector<1x8x32xf32>
      %c0_28 = arith.constant 0 : index
      %c0_29 = arith.constant 0 : index
      %c0_30 = arith.constant 0 : index
      %32 = vector.load %arg9[%c0_28, %c0_29, %c0_30] : memref<1x8x32xf32, #tpu.memory_space<vmem>>, vector<1x8x32xf32>
      tpu.vector_store %arg9[%c0_28, %c0_29, %c0_30], %31 {strides = array<i32>} : memref<1x8x32xf32, #tpu.memory_space<vmem>>, vector<1x8x32xf32>,
      %c0_31 = arith.constant 0 : index
      %c0_32 = arith.constant 0 : index
      %c0_33 = arith.constant 0 : index
      %33 = vector.load %arg10[%c0_31, %c0_32, %c0_33] : memref<1x8x32xf32, #tpu.memory_space<vmem>>, vector<1x8x32xf32>
      tpu.vector_store %arg10[%c0_31, %c0_32, %c0_33], %25 {strides = array<i32>} : memref<1x8x32xf32, #tpu.memory_space<vmem>>, vector<1x8x32xf32>,
    } else {
    }
    return
  }
  func.func @transform_0(%arg0: i32, %arg1: i32, %arg2: i32) -> (i32, i32, i32) {
    %c0_i32 = arith.constant 0 : i32
    %c0_i32_0 = arith.constant 0 : i32
    return %arg0, %arg1, %c0_i32 : i32, i32, i32
  }
  func.func @transform_1(%arg0: i32, %arg1: i32, %arg2: i32) -> (i32, i32, i32) {
    %c0_i32 = arith.constant 0 : i32
    %c0_i32_0 = arith.constant 0 : i32
    return %arg0, %arg2, %c0_i32 : i32, i32, i32
  }
  func.func @transform_2(%arg0: i32, %arg1: i32, %arg2: i32) -> (i32, i32) {
    %c0_i32 = arith.constant 0 : i32
    %c0_i32_0 = arith.constant 0 : i32
    %c0_i32_1 = arith.constant 0 : i32
    return %c0_i32, %c0_i32_0 : i32, i32
  }
  func.func @transform_3(%arg0: i32, %arg1: i32, %arg2: i32) -> (i32, i32) {
    %c0_i32 = arith.constant 0 : i32
    %c0_i32_0 = arith.constant 0 : i32
    %c0_i32_1 = arith.constant 0 : i32
    return %c0_i32, %c0_i32_0 : i32, i32
  }
  func.func @transform_4(%arg0: i32, %arg1: i32, %arg2: i32) -> (i32, i32) {
    %c0_i32 = arith.constant 0 : i32
    %c0_i32_0 = arith.constant 0 : i32
    %c0_i32_1 = arith.constant 0 : i32
    return %c0_i32, %c0_i32_0 : i32, i32
  }
  func.func @transform_5(%arg0: i32, %arg1: i32, %arg2: i32) -> (i32, i32) {
    %c0_i32 = arith.constant 0 : i32
    %c0_i32_0 = arith.constant 0 : i32
    %c0_i32_1 = arith.constant 0 : i32
    return %c0_i32, %c0_i32_0 : i32, i32
  }
  func.func @transform_6(%arg0: i32, %arg1: i32, %arg2: i32) -> (i32, i32, i32) {
    %c0_i32 = arith.constant 0 : i32
    %c0_i32_0 = arith.constant 0 : i32
    return %arg0, %arg1, %c0_i32 : i32, i32, i32
  }
  func.func @transform_7(%arg0: i32, %arg1: i32, %arg2: i32) -> (i32, i32, i32) {
    %c0_i32 = arith.constant 0 : i32
    %c0_i32_0 = arith.constant 0 : i32
    return %arg0, %arg1, %c0_i32 : i32, i32, i32
  }
}

</mosaic_0001>

<bundles_post_ra>
// kernel: tpu_custom_call.1
= control target key start
LH: loop header
LB: loop body
LE: loop exit
PB: predicated region body
PF: predicated region fallthrough
CT: control target
= control target key end

     0   :  { %s1450_s0 = inlined_call_operand.hbm [shape: f32[2,8,32], index: 0, kind: input, shape index: {}]   ;;  %s1451_s1 = inlined_call_operand.hbm [shape: f32[2,8,32], index: 1, kind: input, shape index: {}]   ;;  %s1452_s2 = inlined_call_operand.hbm [shape: bf16[32,32], index: 2, kind: input, shape index: {}]   ;;  %s1453_s3 = inlined_call_operand.vmem [shape: f32[1,32], index: 3, kind: input, shape index: {}]   ;;  %s1454_s4 = inlined_call_operand.vmem [shape: f32[1,32], index: 4, kind: input, shape index: {}]   ;;  %s1455_s5 = inlined_call_operand.<no memory space> [shape: f32[1,1], index: 5, kind: input, shape index: {}]   ;;  %s1456_s6 = inlined_call_operand.hbm [shape: f32[2,8,32], index: 6, kind: output, shape index: {0}]   ;;  %s1457_s7 = inlined_call_operand.hbm [shape: f32[2,8,32], index: 7, kind: output, shape index: {1}]  }
   0x1   :  { %1461 = sst [smem:[#allocation23_spill]] %s1452_s2  ;;  %v13_v0 = vstv %s1455_s5 }
   0x2   :  { %14 = vst [vmem:[#allocation5] sm:$0x1] %v13_v0 }
   0x3   :  { %15 = vsyncpa [#allocation7], 0 }
   0x4   :  { %17 = vsyncpa [#allocation7 + $0x1], 0 }
   0x5   :  { %18 = vsyncpa [#allocation10], 0 }
   0x6   :  { %20 = vsyncpa [#allocation10 + $0x1], 0 }
   0x7   :  { %21 = vsyncpa [#allocation8], 0 }
   0x8   :  { %23 = vsyncpa [#allocation8 + $0x1], 0 }
   0x9   :  { %24 = vsyncpa [#allocation14], 0 }
   0xa   :  { %26 = vsyncpa [#allocation14 + $0x1], 0  ;;  %s1198_s26 = smov 0   ;;  %s1200_s27 = smov 0  }
   0xb   :  { %s1202_s28 = smov 0   ;;  %s1204_s29 = smov 0  }
   0xc   :  { %s1206_s30 = smov 0   ;;  %s1208_s5 = smov 0  }
   0xd LB: > { %1462 = sst [smem:[#allocation20_spill]] %s1139_s30  ;;  %s1229_s8 = sadd.s32 4294967295, %s1143_s5   ;;  %s1143_s5 = sphi %s1208_s5, %s32_s5   ;;  %s1139_s30 = sphi %s1206_s30, %s1478_s30   ;;  %s1135_s29 = sphi %s1204_s29, %s1477_s29   ;;  %s1131_s28 = sphi %s1202_s28, %s1481_s28   ;;  %s1127_s27 = sphi %s1200_s27, %s1480_s27   ;;  %s1123_s26 = sphi %s1198_s26, %s1479_s26  }
   0xe   : > { %s793_s9 = sadd.s32 4294967294, %s1143_s5   ;;  %p73_p0 = scmp.ne.s32.totalorder %s1127_s27, %s1123_s26 }
   0xf   : > { %p74_p1 = scmp.eq.s32.totalorder %s1229_s8, 0  ;;  %p217_p3 = scmp.eq.s32.totalorder %s793_s9, 1 }
  0x10   : > { %p794_p5 = scmp.ge.s32.totalorder %s1143_s5, 1  ;;  %p252_p7 = scmp.lt.s32.totalorder %s1143_s5, 3 }
  0x11   : > { %p1238_p4 = por %p74_p1, %p73_p0  ;;  %p1243_p6 = por %p217_p3, %p73_p0 }
  0x12   : > { %p1248_p8 = pnand %p794_p5, %p252_p7  ;;  %s1145_s13 = smov [#allocation11]  }
  0x13   : > { %s1464_s11 = scalar_select %p1243_p6, 1, 0 }
  0x14   : > { %s264_s14 = sshll.u32 %s1145_s13, 4  ;;  %p860_p9 = pneg %p1248_p8  ;;  %s265_s14 = int_to_ptr.vmem [resolvable:$true] %s264_s14 }
  0x15   : > { %1465 = sst [smem:[#allocation21_spill]] %s1464_s11  ;;  %s51_s16 = sadd.s32 1, %s1139_s30 }
  0x16   : > { %p1257_p11 = pnand %p860_p9, %p74_p1  ;;  %s954_s17 = scalar_lea.vmem %s265_s14, 256 }
  0x17   : > { %p955_p13 = scmp.ne.s32.totalorder %s265_s14, %s954_s17  ;;  %p962_p5 = scmp.lt.s32.totalorder %s265_s14, %s265_s14 }
  0x18   : > { %p945_p12 = pneg %p1257_p11  ;;  %p963_p7 = scmp.lt.s32.totalorder %s954_s17, %s954_s17 }
  0x1a   : > { %p957_p0 = pnand %p955_p13, %p945_p12  ;;  %p964_p2 = por %p963_p7, %p962_p5 }
  0x1c   : > { %p958_p3 = pneg %p957_p0 }
  0x1e   : > { %p965_p6 = pnand %p964_p2, %p958_p3 }
  0x20   : > { %968 = shalt.err (!%p965_p6)
}
  0x21   : > { %s1146_s18 = smov 64   ;;  %s1147_s19 = smov 4  }
  0x22   : > { %s1468_s2 = sld [smem:[#allocation23_spill]]  ;;  %p53_p2 = scmp.ge.s32.totalorder %s51_s16, 2 }
  0x23   : > { %s60_s22 = sadd.s32 1, %s1131_s28  ;;  %p67_p6 = scmp.ne.s32.totalorder %s1131_s28, %s1127_s27 }
  0x24   : > { %p68_p9 = scmp.eq.s32.totalorder %s1143_s5, 0  ;;  %s1483_s16 = smov (%p53_p2, %s51_s16), 0 }
  0x25   : > { %1469 = sst [smem:[#allocation22_spill]] %s1483_s16  ;;  %p1471_p13 = scmp.eq.s32.totalorder %s1229_s8, 1 }
  0x26   : > { %p1275_p12 = por %p68_p9, %p67_p6  ;;  %s55_s25 = ssub.s32 %s1139_s30, %s1483_s16 }
  0x27   : > { %p1281_p0 = por %p1471_p13, %p67_p6  ;;  %p58_p3 = scmp.eq.s32.totalorder %s55_s25, 0 }
  0x28   : > { %863 = dma.hbm_to_vmem [thread:$0]  (!%p1257_p11), %s1468_s2, 256, %s265_s14, [#allocation10], %s1146_s18, %s1146_s18, %s1147_s19  }
  0x29   : > { %p879_p11 = scmp.lt.s32.totalorder %s1143_s5, 2  ;;  %s287_s9 = sand.u32 1, %s1131_s28  }
  0x2a   : > { %s797_s13 = sshll.u32 %s287_s9, 3  ;;  %s798_s15 = sshll.u32 %s1139_s30, 7 }
  0x2b   : > { %s1290_s14 = scalar_select %p58_p3, %s1131_s28, %s60_s22  }
  0x2c   : > { %s297_s19 = scalar_lea.hbm %s1450_s0, %s798_s15  ;;  %s291_s20 = scalar_lea.vmem [#allocation6], %s797_s13 }
  0x2d   : > { %s299_s21 = sshll.u32 %s291_s20, 4  ;;  %p1298_p5 = pnand %p879_p11, %p1275_p12  ;;  %s300_s21 = int_to_ptr.vmem [resolvable:$true] %s299_s21 }
  0x2e   : > { %s1305_s22 = scalar_lea.hbm %s1451_s1, %s798_s15  ;;  %s306_s25 = sand.u32 1, %s1143_s5  }
  0x2f   : > { %s288_s30 = scalar_lea.sflag [#allocation7], %s287_s9  ;;  %p971_p7 = pneg %p1298_p5 }
  0x30   : > { %s982_s17 = scalar_lea.vmem %s300_s21, 128  ;;  %s1148_s23 = smov [#allocation6]  }
  0x31   : > { %p983_p2 = scmp.ne.s32.totalorder %s300_s21, %s982_s17  ;;  %s987_s18 = sshll.u32 %s1148_s23, 4  ;;  %s988_s18 = int_to_ptr.vmem [resolvable:$false] %s987_s18 }
  0x32   : > { %s989_s20 = scalar_lea.vmem %s988_s18, 256  ;;  %p990_p12 = scmp.lt.s32.totalorder %s300_s21, %s988_s18 }
  0x33   : > { %p985_p6 = pnand %p983_p2, %p971_p7  ;;  %p991_p13 = scmp.lt.s32.totalorder %s989_s20, %s982_s17 }
  0x35   : > { %p986_p9 = pneg %p985_p6  ;;  %p992_p11 = por %p991_p13, %p990_p12 }
  0x37   : > { %p993_p3 = pnand %p992_p11, %p986_p9 }
  0x39   : > { %996 = shalt.err (!%p993_p3)
}
  0x3a   : > { %867 = dma.hbm_to_vmem [thread:$0]  (!%p1298_p5), %s297_s19, 128, %s300_s21, %s288_s30  }
  0x3b   : > { %s310_s11 = scalar_lea.vmem [#allocation9], %s797_s13  ;;  %s307_s9 = scalar_lea.sflag [#allocation10], %s306_s25 }
  0x3c   : > { %s318_s16 = sshll.u32 %s310_s11, 4  ;;  %s1149_s23 = smov [#allocation9]   ;;  %s319_s16 = int_to_ptr.vmem [resolvable:$true] %s318_s16 }
  0x3d   : > { %s1010_s15 = scalar_lea.vmem %s319_s16, 128  ;;  %s1015_s18 = sshll.u32 %s1149_s23, 4  ;;  %s1016_s18 = int_to_ptr.vmem [resolvable:$false] %s1015_s18 }
  0x3e   : > { %p1011_p2 = scmp.ne.s32.totalorder %s319_s16, %s1010_s15  ;;  %s1017_s17 = scalar_lea.vmem %s1016_s18, 256 }
  0x3f   : > { %p1018_p9 = scmp.lt.s32.totalorder %s319_s16, %s1016_s18  ;;  %p1019_p12 = scmp.lt.s32.totalorder %s1017_s17, %s1010_s15 }
  0x40   : > { %p1013_p6 = pnand %p1011_p2, %p971_p7 }
  0x41   : > { %p1020_p13 = por %p1019_p12, %p1018_p9 }
  0x42   : > { %p1014_p10 = pneg %p1013_p6 }
  0x44   : > { %p1021_p11 = pnand %p1020_p13, %p1014_p10 }
  0x46   : > { %1024 = shalt.err (!%p1021_p11)
}
  0x47   : > { %870 = dma.hbm_to_vmem [thread:$0]  (!%p1298_p5), %s1305_s22, 128, %s319_s16, %s307_s9  }
  0x48   : > { %327 = sbr.rel (%p1248_p8) target bundleno = 767 (0x2ff), region = 44  ;;  %s1324_s30 = sand.u32 (!%p1248_p8), 1, %s1127_s27  }
  0x49   : > { %s1327_s13 = sshll.u32 (!%p1248_p8), %s1324_s30, 3  ;;  %s330_s19 = scalar_lea.sflag (!%p1248_p8), [#allocation7], %s1324_s30 }
  0x4a   : > { %s333_s21 = scalar_lea.vmem (!%p1248_p8), [#allocation6], %s1327_s13 }
  0x4d   : > { %1102 = dma.done.wait (%p1238_p4), %s330_s19, 128  }
  0x4e   : > { %1104 = vsyncadd (%p1238_p4), %s330_s19, 4294967168  ;;  %s338_s2 = sand.u32 1, %s1229_s8   ;;  %s342_s22 = scalar_lea.vmem [#allocation9], %s1327_s13 }
  0x4f   : > { %s339_s12 = scalar_lea.sflag [#allocation10], %s338_s2 }
  0x50   : > { %1106 = dma.done.wait (%p1238_p4), %s339_s12, 128  }
  0x51   : > { %1108 = vsyncadd (%p1238_p4), %s339_s12, 4294967168 }
  0x52   : > { %1110 = dma.done.wait (%p74_p1), [#allocation10], 256  }
  0x53   : > { %1112 = vsyncadd (%p74_p1), [#allocation10], 4294967040  ;;  %vm419_vm0 = vcmask 261120   ;;  %v1150_v1 = vmov 0.0   ;;  %vm1151_vm1 = vmmov 0   ;;  %v937_v2 = vld [vmem:[#allocation11 + $0x8] sm:$0xff]  }
  0x54   : > { %828 = vmatprep.subr.bf16.mxu0 %v1150_v1  ;;  %832 = vmatprep.mubr.msk.bf16.mxu0 %vm1151_vm1, %v1150_v1  ;;  %487 = vst.msk [vmem:[#allocation2] sm:$0xff] %vm419_vm0, %v1150_v1  ;;  %v938_v3 = vld [vmem:[#allocation11] sm:$0xff]   ;;  %v811_v5 = vld [vmem:[%s1453_s3] ss:$0 sm:$0xff]  ;;  %v388_v9 = vld [vmem:[%s342_s22] sm:$0xff]  ;;  %v1152_v12 = vmov 0  }
  0x55   : > { %836 = vmatprep.subr.bf16.mxu1 %v1150_v1  ;;  %838 = vmatprep.mubr.msk.bf16.mxu1 %vm1151_vm1, %v1150_v1  ;;  %v1348_v4 = vld [vmem:[%s333_s21] sm:$0xff]  ;;  %v389_v10 = vpack.c.bf16 %v388_v9, %v388_v9  ;;  %v812_v13 = vld [vmem:[#allocation5] ss:$0 sm:$0xff]  ;;  %vm485_vm2 = vcmask 7168   ;;  %vm464_vm3 = vcmask 257024   ;;  %vm553_vm4 = vcmask 1043456  }
  0x56   : > { %829 = vmatpush3.bf16.msra.mxu0 %v937_v2  ;;  %v473_v6 = vmul.f32 %v811_v5, %v1348_v4  ;;  %v395_v7 = vpack.c.bf16 %v1348_v4, %v1348_v4  ;;  %936 = vset.pattern.permute.xlu0 %v1152_v12  ;;  %v807_v17 = vld [vmem:[%s1454_s4] ss:$0 sm:$0xff]  ;;  %vm549_vm5 = vcmask 64512   ;;  %s817_s11 = sshll.u32 %s1135_s29, 7  ;;  %s386_s16 = scalar_lea.vmem [#allocation13], %s1327_s13  ;;  %v603_v44 = vadd.f32 1.0, %v1348_v4 }
  0x57   : > { %830 = vmatprep.subr.bf16.mxu0 %v1150_v1  ;;  %v500_v11 = vsel %vm419_vm0, %v389_v10, 0  ;;  %v554_v25 = vsel %vm553_vm4, %v389_v10, 0  ;;  %s643_s9 = sshll.u32 %s386_s16, 4  ;;  %s1373_s18 = scalar_lea.hbm %s1457_s7, %s817_s11  ;;  %s1375_s9 = int_to_ptr.vmem [resolvable:$true] %s643_s9 }
  0x58   : > { %v474_v8 = vsel %vm419_vm0, %v473_v6, 0.0  ;;  %837 = vmatpush3.bf16.xpose.msra.mxu1 %v500_v11  ;;  %s379_s17 = scalar_lea.vmem [#allocation12], %s1327_s13  ;;  %s615_s21 = scalar_lea.sflag [#allocation14], %s1324_s30 }
  0x59   : > { %475 = vadd.xlane.f32.xlu0 %v474_v8  ;;  %s1380_s19 = sshll.u32 %s379_s17, 4  ;;  %s1025_s2 = scalar_lea.vmem %s1375_s9, 128  ;;  %s630_s19 = int_to_ptr.vmem [resolvable:$true] %s1380_s19 }
  0x5a   : > { %831 = vmatpush3.bf16.msra.mxu0 %v938_v3  ;;  %p1026_p1 = scmp.ne.s32.totalorder %s1375_s9, %s1025_s2  ;;  %s1153_s12 = smov [#allocation13]  }
  0x5b   : > { %842 = vmatprep.subr.bf16.mxu0 %v1150_v1  ;;  %v548_v38 = vld [vmem:[#allocation2] sm:$0xff]  ;;  %s1029_s22 = sshll.u32 %s1153_s12, 4  ;;  %s1030_s22 = int_to_ptr.vmem [resolvable:$false] %s1029_s22 }
  0x5c   : > { %p1027_p4 = pnand %p1026_p1, %p1281_p0  ;;  %s1031_s10 = scalar_lea.vmem %s1030_s22, 256 }
  0x5d   : > { %833 = vmatmul.mubr.msk.bf16.vlgmr.msra.gmra.mxu0 %vm419_vm0, %v395_v7  ;;  %p1032_p10 = scmp.lt.s32.totalorder %s1375_s9, %s1030_s22  ;;  %p1033_p5 = scmp.lt.s32.totalorder %s1031_s10, %s1025_s2 }
  0x5e   : > { %844 = vmatprep.mubr.msk.bf16.mxu0 %vm1151_vm1, %v1150_v1  ;;  %843 = vmatpush3.bf16.msra.mxu0 %v554_v25  ;;  %p1028_p8 = pneg %p1027_p4 }
  0x5f   : > { %p1034_p7 = por %p1033_p5, %p1032_p10 }
  0x61   : > { %p1035_p3 = pnand %p1034_p7, %p1028_p8 }
  0xe2   : > { %v476_v14 = vpop.xlane.xlu0 %475 }
  0xe3   : > { %v484_v15 = vadd.f32 %v812_v13, %v476_v14 }
  0xe5   : > { %486 = vst.msk [vmem:[#allocation4] sm:$0xff] %vm485_vm2, %v484_v15 }
  0xec   : > { %v489_v16 = vld [vmem:[#allocation4] sm:$0xff] }
  0xed   : > { %492 = vperm.xlu0 %936, %v489_v16  }
 0x11d   : > { %v457_v18 = vpop.f32.mrf.mxu0 }
 0x11e   : > { %v458_v19 = vadd.f32 %v807_v17, %v457_v18 }
 0x11f   : > { %v834_v20 = vpop.f32.mrf.mxu0 }
 0x120   : > { %v463_v21 = vpack.c.bf16 %v458_v19, %v458_v19 }
 0x121   : > { %v460_v22 = vpop.f32.mrf.mxu0 }
 0x122   : > { %465 = vst.msk [vmem:[#allocation3] sm:$0xf] %vm464_vm3, %v463_v21 }
 0x123   : > { %v835_v23 = vpop.f32.mrf.mxu0 }
 0x129   : > { %v488_v24 = vld [vmem:[#allocation3] sm:$0xf] }
 0x12a   : > { %839 = vmatmul.mubr.msk.bf16.vlgmr.msra.gmra.mxu1 %vm419_vm0, %v488_v24 }
 0x168   : > { %v493_v26 = vpop.permute.xlu0 %492 }
 0x1ea   : > { %v536_v27 = vpop.f32.mrf.mxu1 }
 0x1eb   : > { %v537_v28 = vadd.f32 %v536_v27, %v493_v26 }
 0x1ec   : > { %v840_v29 = vpop.f32.mrf.mxu1 }
 0x1ed   : > { %v542_v30 = vsub.f32 0.0, %v537_v28 }
 0x1ee   : > { %v539_v31 = vpop.f32.mrf.mxu1 }
 0x1ef   : > { %v543_v32 = vmul.f32 1.442695, %v542_v30 }
 0x1f0   : > { %v841_v33 = vpop.f32.mrf.mxu1 }
 0x1f1   : > { %939 = vpow2.f32 %v543_v32 }
 0x1fe   : > { %v940_v34 = vpop.eup %939 }
 0x1ff   : > { %v545_v35 = vadd.f32 1.0, %v940_v34 }
 0x201   : > { %941 = vrcp.f32 %v545_v35 }
 0x20e   : > { %v942_v36 = vpop.eup %941 }
 0x20f   : > { %v547_v37 = vpack.c.bf16 %v942_v36, %v942_v36 }
 0x211   : > { %845 = vmatmul.mubr.msk.bf16.vlgmr.msra.gmra.mxu0 %vm549_vm5, %v547_v37 }
 0x2d1   : > { %v590_v39 = vpop.f32.mrf.mxu0 }
 0x2d2   : > { %v596_v40 = vadd.f32 %v590_v39, %v548_v38 }
 0x2d3   : > { %v846_v41 = vpop.f32.mrf.mxu0 }
 0x2d4   : > { %597 = vst.msk [vmem:[#allocation2] sm:$0xff] %vm419_vm0, %v596_v40 }
 0x2d5   : > { %v593_v42 = vpop.f32.mrf.mxu0 }
 0x2d7   : > { %v847_v43 = vpop.f32.mrf.mxu0 }
 0x2db   : > { %v602_v45 = vld [vmem:[#allocation2] sm:$0xff] }
 0x2dc   : > { %v604_v46 = vmul.f32 %v603_v44, %v602_v45  ;;  %608 = vst.msk [vmem:[%s386_s16] sm:$0xff] %vm419_vm0, %v602_v45 }
 0x2dd   : > { %1038 = shalt.err (!%p1035_p3)
}
 0x2de   : > { %s1039_s25 = scalar_lea.hbm %s1373_s18, 128  ;;  %s1043_s16 = scalar_lea.hbm %s1457_s7, 256 }
 0x2df   : > { %p1040_p2 = scmp.ne.s32.totalorder %s1373_s18, %s1039_s25  ;;  %p1044_p12 = scmp.lt.s32.totalorder %s1373_s18, %s1457_s7 }
 0x2e0   : > { %p1045_p13 = scmp.lt.s32.totalorder %s1043_s16, %s1039_s25 }
 0x2e1   : > { %p1041_p6 = pnand %p1040_p2, %p1281_p0 }
 0x2e2   : > { %p1046_p11 = por %p1045_p13, %p1044_p12 }
 0x2e3   : > { %p1042_p9 = pneg %p1041_p6 }
 0x2e5   : > { %p1047_p1 = pnand %p1046_p11, %p1042_p9 }
 0x2e7   : > { %1050 = shalt.err (!%p1047_p1)
}
 0x2e8   : > { %857 = dma.vmem_to_hbm [thread:$0]  (%p1281_p0), %s1375_s9, 128, %s1373_s18, %s615_s21   ;;  %v605_v47 = vsub.f32 %v604_v46, %v1348_v4 }
 0x2e9   : > { %s627_s22 = scalar_lea.hbm %s1456_s6, %s817_s11  ;;  %s610_s10 = scalar_lea.sflag [#allocation8], %s1324_s30 }
 0x2ea   : > { %v606_v48 = vmul.f32 0.5, %v605_v47  ;;  %s1051_s25 = scalar_lea.vmem %s630_s19, 128  ;;  %s1154_s8 = smov [#allocation12]  }
 0x2eb   : > { %p1052_p4 = scmp.ne.s32.totalorder %s630_s19, %s1051_s25  ;;  %s1055_s9 = sshll.u32 %s1154_s8, 4  ;;  %s1056_s9 = int_to_ptr.vmem [resolvable:$false] %s1055_s9 }
 0x2ec   : > { %607 = vst.msk [vmem:[%s379_s17] sm:$0xff] %vm419_vm0, %v606_v48  ;;  %s1057_s18 = scalar_lea.vmem %s1056_s9, 256  ;;  %p1058_p5 = scmp.lt.s32.totalorder %s630_s19, %s1056_s9 }
 0x2ed   : > { %p1053_p8 = pnand %p1052_p4, %p1281_p0  ;;  %p1059_p7 = scmp.lt.s32.totalorder %s1057_s18, %s1051_s25 }
 0x2ef   : > { %p1054_p10 = pneg %p1053_p8  ;;  %p1060_p3 = por %p1059_p7, %p1058_p5 }
 0x2f1   : > { %p1061_p2 = pnand %p1060_p3, %p1054_p10 }
 0x2f3   : > { %1064 = shalt.err (!%p1061_p2)
}
 0x2f4   : > { %s1065_s29 = scalar_lea.hbm %s627_s22, 128  ;;  %s1069_s11 = scalar_lea.hbm %s1456_s6, 256 }
 0x2f5   : > { %p1066_p6 = scmp.ne.s32.totalorder %s627_s22, %s1065_s29  ;;  %p1070_p13 = scmp.lt.s32.totalorder %s627_s22, %s1456_s6 }
 0x2f6   : > { %p1071_p11 = scmp.lt.s32.totalorder %s1069_s11, %s1065_s29 }
 0x2f7   : > { %p1067_p9 = pnand %p1066_p6, %p1281_p0 }
 0x2f8   : > { %p1072_p1 = por %p1071_p11, %p1070_p13 }
 0x2f9   : > { %p1068_p12 = pneg %p1067_p9 }
 0x2fb   : > { %p1073_p4 = pnand %p1072_p1, %p1068_p12 }
 0x2fd   : > { %1076 = shalt.err (!%p1073_p4)
}
 0x2fe   : > { %856 = dma.vmem_to_hbm [thread:$0]  (%p1281_p0), %s630_s19, 128, %s627_s22, %s610_s10  }
 0x2ff PF: > { %s1474_s20 = sld [smem:[#allocation21_spill]]  ;;  %s655_s16 = sand.u32 1, %s1123_s26  }
 0x300   : > { %p1476_p10 = scmp.ge.s32.totalorder %s1143_s5, 2  ;;  %s656_s15 = scalar_lea.sflag [#allocation8], %s655_s16 }
 0x305   : > { %p1475_p8 = scmp.ne.s32.totalorder %s1474_s20, 0 }
 0x307   : > { %p872_p5 = pnand %p1476_p10, %p1475_p8 }
 0x309   : > { %p873_p7 = pneg %p872_p5 }
 0x30b   : > { %1114 = dma.done.wait (%p873_p7), %s656_s15, 128  }
 0x30c   : > { %1116 = vsyncadd (%p873_p7), %s656_s15, 4294967168  ;;  %s665_s23 = scalar_lea.sflag [#allocation14], %s655_s16 }
 0x30d   : > { %1118 = dma.done.wait (%p873_p7), %s665_s23, 128  }
 0x30e   : > { %1120 = vsyncadd (%p873_p7), %s665_s23, 4294967168  ;;  %s32_s5 = sadd.s32 1, %s1143_s5   ;;  %s1477_s29 = sld [smem:[#allocation20_spill]] }
 0x30f   : > { %p29_p3 = scmp.ge.s32.totalorder %s32_s5, 4   ;;  %s1478_s30 = sld [smem:[#allocation22_spill]] }
 0x310   : > { %s1479_s26 = smov %s1127_s27  ;;  %s1480_s27 = smov %s1131_s28 }
 0x311   : > { %s1481_s28 = smov %s1290_s14  ;;  %31 = sbr.rel (!%p29_p3) target bundleno = 13 (0xd), region = 131 }
 0x316   :  { %670 = vsyncpa [#allocation7], 1 }
 0x317   :  { %672 = vsyncpa [#allocation7 + $0x1], 1 }
 0x318   :  { %673 = vsyncpa [#allocation10], 1 }
 0x319   :  { %675 = vsyncpa [#allocation10 + $0x1], 1 }
 0x31a   :  { %676 = vsyncpa [#allocation8], 1 }
 0x31b   :  { %678 = vsyncpa [#allocation8 + $0x1], 1 }
 0x31c   :  { %679 = vsyncpa [#allocation14], 1 }
 0x31d   :  { %681 = vsyncpa [#allocation14 + $0x1], 1 }

</bundles_post_ra>
